<compile_context>
chip_gen: v6e
topology: v6e:2x2x1
jax: 0.10.0
libtpu: 0.0.40
codegen_flags: <defaults>
</compile_context>

<pallas_src>
import math
import functools

import jax
import jax.numpy as jnp
from jax.experimental import pallas as pl
from jax.experimental.pallas import tpu as pltpu


LANE = 128     # lane width  (last dim)
SUBLANE = 8    # sublane     (second-to-last dim, f32)


def _round_up(x, m):
    return (x + m - 1) // m * m


# ------------------------------ fused kernel -------------------------------

def _make_fused_kernel(num_blocks):
    """Kernel over padded tensors.

    Arg order (PrefetchScalarGridSpec): alpha(SMEM), beta(SMEM, pre-clamped),
      x, [w1r, b1r, w2, b2] * num_blocks, out_w, out_b, o_ref
      x    : (TM, In_p)         f32
      w1r  : (In_p, 2*H_p)      bf16   == [w1 | w_residual] fused on lane axis
      b1r  : (1, 2*H_p)         f32    == [b1 | b_residual]
      w2   : (H_p, H_p) bf16, b2: (1, H_p) f32
      out_w: (H_p, Out_p) bf16, out_b: (1, Out_p) f32
      o    : (TM, Out_p)        f32
    """
    def kernel(alpha_ref, beta_ref, x_ref, *rest):
        o_ref = rest[-1]
        refs = rest[:-1]
        block_refs = refs[:4 * num_blocks]
        ow_ref, ob_ref = refs[4 * num_blocks], refs[4 * num_blocks + 1]

        h = x_ref[...]                                   # f32 (TM, In_p)
        for i in range(num_blocks):                      # static unroll
            w1r_ref, b1r_ref, w2_ref, b2_ref = block_refs[4 * i:4 * i + 4]
            alpha = alpha_ref[i]                         # SMEM scalar
            beta = beta_ref[i]                           # SMEM scalar (clamped)
            H = w2_ref.shape[0]

            # one bf16 MXU GEMM for fc1 and fc_residual (shared LHS),
            # lane-dense N = 2*H_p; accumulate in f32.
            hr = jnp.dot(h.astype(jnp.bfloat16), w1r_ref[...],
                         preferred_element_type=jnp.float32) + b1r_ref[...]
            t = jnp.tanh(alpha * hr[:, :H])              # activation(fc1(x))
            r = hr[:, H:]                                # fc_residual(x)
            t = jnp.dot(t.astype(jnp.bfloat16), w2_ref[...],
                        preferred_element_type=jnp.float32) + b2_ref[...]
            h = jnp.tanh(alpha * (beta * t + (1.0 - beta) * r))

        o_ref[...] = (jnp.dot(h.astype(jnp.bfloat16), ow_ref[...],
                              preferred_element_type=jnp.float32)
                      + ob_ref[...])
    return kernel


# ------------------------ parameter initialization -------------------------

def _xavier_uniform(key, fan_in, fan_out):
    # Matches torch.nn.init.xavier_uniform_ (gain=1). Stored as (in, out).
    bound = math.sqrt(6.0 / (fan_in + fan_out))
    return jax.random.uniform(key, (fan_in, fan_out), jnp.float32, -bound, bound)


def _linear_bias(key, fan_in, fan_out):
    # torch.nn.Linear default bias init: U(-1/sqrt(fan_in), 1/sqrt(fan_in)).
    bound = 1.0 / math.sqrt(fan_in)
    return jax.random.uniform(key, (1, fan_out), jnp.float32, -bound, bound)


def init_adaptive_resnet_params(key, input_size, output_size, residual_blocks_neurons):
    params = {"blocks": []}
    prev = input_size
    for neurons in residual_blocks_neurons:
        key, k1, k1b, k2, k2b, kr, krb = jax.random.split(key, 7)
        params["blocks"].append({
            "w1": _xavier_uniform(k1, prev, neurons),
            "b1": _linear_bias(k1b, prev, neurons),
            "w2": _xavier_uniform(k2, neurons, neurons),
            "b2": _linear_bias(k2b, neurons, neurons),
            "wr": _xavier_uniform(kr, prev, neurons),
            "br": _linear_bias(krb, prev, neurons),
            "alpha": jnp.float32(0.9),   # AdaptiveActivation.alpha
            "beta": jnp.float32(0.9),    # ResidualBlock.beta
        })
        prev = neurons
    key, kw, kb = jax.random.split(key, 3)
    params["out_w"] = _xavier_uniform(kw, prev, output_size)
    params["out_b"] = _linear_bias(kb, prev, output_size)
    return params


# --------------------- pack/pad params for the kernel ----------------------

def pack_params(params, input_size):
    """Zero-pad all feature dims to multiples of 128, fuse w1||wr, bf16 weights."""
    prev_p = _round_up(input_size, LANE)
    blocks_packed = []
    alphas, betas = [], []
    for blk in params["blocks"]:
        In, H = blk["w1"].shape
        H_p = _round_up(H, LANE)
        w1r = jnp.zeros((prev_p, 2 * H_p), jnp.float32)
        w1r = w1r.at[:In, :H].set(blk["w1"])
        w1r = w1r.at[:In, H_p:H_p + H].set(blk["wr"])
        b1r = jnp.zeros((1, 2 * H_p), jnp.float32)
        b1r = b1r.at[:, :H].set(blk["b1"])
        b1r = b1r.at[:, H_p:H_p + H].set(blk["br"])
        w2 = jnp.zeros((H_p, H_p), jnp.float32).at[:H, :H].set(blk["w2"])
        b2 = jnp.zeros((1, H_p), jnp.float32).at[:, :H].set(blk["b2"])
        blocks_packed.append((w1r.astype(jnp.bfloat16), b1r,
                              w2.astype(jnp.bfloat16), b2))
        alphas.append(jnp.asarray(blk["alpha"], jnp.float32).reshape(()))
        betas.append(jnp.asarray(blk["beta"], jnp.float32).reshape(()))
        prev_p = H_p
    H_last, Out = params["out_w"].shape
    Out_p = _round_up(Out, LANE)
    ow = jnp.zeros((prev_p, Out_p), jnp.float32).at[:H_last, :Out].set(params["out_w"])
    ob = jnp.zeros((1, Out_p), jnp.float32).at[:, :Out].set(params["out_b"])
    return {
        "alphas": jnp.stack(alphas),
        "betas": jnp.stack(betas),
        "blocks": blocks_packed,
        "out_w": ow.astype(jnp.bfloat16),
        "out_b": ob,
    }


# ------------------------------ forward pass -------------------------------

@functools.partial(jax.jit, static_argnames=("out_size", "block_rows"))
def adaptive_resnet_forward(packed, x, *, out_size, block_rows=256):
    num_blocks = len(packed["blocks"])
    B, In = x.shape
    In_p = packed["blocks"][0][0].shape[0]
    Out_p = packed["out_w"].shape[1]

    # batch tile (MXU M dim): single tile for small B, else block_rows.
    if B <= block_rows:
        tm = _round_up(B, SUBLANE)
    else:
        tm = block_rows
    B_p = _round_up(B, tm)

    # Pad only when needed (lane pad for features, row pad for ragged batch).
    # Padded lanes stay exactly zero through the net (padded weight cols /
    # bias lanes are zero); padded rows are garbage and are sliced off.
    if (B_p, In_p) != (B, In):
        x_p = jnp.pad(x.astype(jnp.float32), ((0, B_p - B), (0, In_p - In)))
    else:
        x_p = x.astype(jnp.float32)

    # Clamp beta here (same semantics as torch.clamp in forward).
    betas = jnp.clip(packed["betas"], 0.01, 1.0)

    row_spec = lambda i, *_: (i, 0)     # batch-tiled
    const_spec = lambda i, *_: (0, 0)   # VMEM-resident weights

    flat_inputs = [x_p]
    in_specs = [pl.BlockSpec((tm, In_p), row_spec)]
    for (w1r, b1r, w2, b2) in packed["blocks"]:
        flat_inputs += [w1r, b1r, w2, b2]
        in_specs += [pl.BlockSpec(w1r.shape, const_spec),
                     pl.BlockSpec(b1r.shape, const_spec),
                     pl.BlockSpec(w2.shape, const_spec),
                     pl.BlockSpec(b2.shape, const_spec)]
    flat_inputs += [packed["out_w"], packed["out_b"]]
    in_specs += [pl.BlockSpec(packed["out_w"].shape, const_spec),
                 pl.BlockSpec(packed["out_b"].shape, const_spec)]

    # VMEM budget: resident weights (x2 for pipeline buffers) + double-buffered
    # activation tiles + headroom; capped below v7x physical (64 MiB).
    def _nbytes(a):
        return int(a.size) * a.dtype.itemsize
    weight_bytes = sum(_nbytes(w) for blk in packed["blocks"] for w in blk)
    weight_bytes += _nbytes(packed["out_w"]) + _nbytes(packed["out_b"])
    act_bytes = 2 * tm * (In_p + Out_p) * 4
    vmem_limit = int(min(64 * 1024 * 1024,
                         max(16 * 1024 * 1024,
                             2 * weight_bytes + act_bytes + (4 << 20))))

    out_p = pl.pallas_call(
        _make_fused_kernel(num_blocks),
        out_shape=jax.ShapeDtypeStruct((B_p, Out_p), jnp.float32),
        grid_spec=pltpu.PrefetchScalarGridSpec(
            num_scalar_prefetch=2,
            grid=(B_p // tm,),
            in_specs=in_specs,
            out_specs=pl.BlockSpec((tm, Out_p), row_spec),
        ),
        compiler_params=pltpu.CompilerParams(
            dimension_semantics=("parallel",),
            vmem_limit_bytes=vmem_limit,
        ),
    )(packed["alphas"], betas, *flat_inputs)

    return out_p[:B, :out_size]


def adaptive_resnet_reference(params, x):
    """Pure-JAX f32 reference mirroring the PyTorch forward (sanity check)."""
    h = x
    for blk in params["blocks"]:
        alpha = blk["alpha"]
        beta = jnp.clip(blk["beta"], 0.01, 1.0)
        t = jnp.tanh(alpha * (h @ blk["w1"] + blk["b1"]))
        t = t @ blk["w2"] + blk["b2"]
        r = h @ blk["wr"] + blk["br"]
        h = jnp.tanh(alpha * (beta * t + (1 - beta) * r))
    return h @ params["out_w"] + params["out_b"]


# ---------------------------------- main -----------------------------------

if __name__ == "__main__":
    key = jax.random.PRNGKey(0)

    input_size = 32
    residual_blocks_neurons = [64, 64]
    output_size = 16

    key, kp = jax.random.split(key)
    params = init_adaptive_resnet_params(kp, input_size, output_size,
                                         residual_blocks_neurons)
    packed = pack_params(params, input_size)

    # (small batch, single tile) and (multi-tile grid with ragged last tile)
    for batch, tm in ((8, 256), (200, 128)):
        key, kx = jax.random.split(key)
        x = jax.random.normal(kx, (batch, input_size), jnp.float32)

        out = adaptive_resnet_forward(packed, x, out_size=output_size,
                                      block_rows=tm)
        out = jax.block_until_ready(out)

        ref = adaptive_resnet_reference(params, x)
        assert out.shape == (batch, output_size)
        # bf16 MXU operands vs f32 reference -> loosened tolerance.
        assert jnp.allclose(out, ref, atol=5e-2, rtol=5e-2), (
            f"mismatch vs reference (batch={batch}), "
            f"max abs diff {float(jnp.max(jnp.abs(out - ref)))}")

    print("KERNEL_OK")
</pallas_src>

<mosaic_0001>
module attributes {stable_mosaic.version = 11 : i64} {
  func.func @kernel(%arg0: i32, %arg1: memref<2xf32, #tpu.memory_space<smem>>, %arg2: memref<2xf32, #tpu.memory_space<smem>>, %arg3: memref<8x128xf32, #tpu.memory_space<vmem>>, %arg4: memref<128x256xbf16, #tpu.memory_space<vmem>>, %arg5: memref<1x256xf32, #tpu.memory_space<vmem>>, %arg6: memref<128x128xbf16, #tpu.memory_space<vmem>>, %arg7: memref<1x128xf32, #tpu.memory_space<vmem>>, %arg8: memref<128x256xbf16, #tpu.memory_space<vmem>>, %arg9: memref<1x256xf32, #tpu.memory_space<vmem>>, %arg10: memref<128x128xbf16, #tpu.memory_space<vmem>>, %arg11: memref<1x128xf32, #tpu.memory_space<vmem>>, %arg12: memref<128x128xbf16, #tpu.memory_space<vmem>>, %arg13: memref<1x128xf32, #tpu.memory_space<vmem>>, %arg14: memref<8x128xf32, #tpu.memory_space<vmem>>) attributes {dimension_semantics = [#tpu.dimension_semantics<parallel>], iteration_bounds = array<i64: 1>, scalar_prefetch = 2 : i64, scratch_operands = 0 : i64, tpu.core_type = #tpu.core_type<tc>, window_params = [{transform_indices = @transform_0, window_bounds = array<i64: 8, 128>}, {pipeline_mode = #tpu.pipeline_mode<synchronous>, transform_indices = @transform_1, window_bounds = array<i64: 128, 256>}, {pipeline_mode = #tpu.pipeline_mode<synchronous>, transform_indices = @transform_2, window_bounds = array<i64: 1, 256>}, {pipeline_mode = #tpu.pipeline_mode<synchronous>, transform_indices = @transform_3, window_bounds = array<i64: 128, 128>}, {pipeline_mode = #tpu.pipeline_mode<synchronous>, transform_indices = @transform_4, window_bounds = array<i64: 1, 128>}, {pipeline_mode = #tpu.pipeline_mode<synchronous>, transform_indices = @transform_5, window_bounds = array<i64: 128, 256>}, {pipeline_mode = #tpu.pipeline_mode<synchronous>, transform_indices = @transform_6, window_bounds = array<i64: 1, 256>}, {pipeline_mode = #tpu.pipeline_mode<synchronous>, transform_indices = @transform_7, window_bounds = array<i64: 128, 128>}, {pipeline_mode = #tpu.pipeline_mode<synchronous>, transform_indices = @transform_8, window_bounds = array<i64: 1, 128>}, {pipeline_mode = #tpu.pipeline_mode<synchronous>, transform_indices = @transform_9, window_bounds = array<i64: 128, 128>}, {pipeline_mode = #tpu.pipeline_mode<synchronous>, transform_indices = @transform_10, window_bounds = array<i64: 1, 128>}, {transform_indices = @transform_11, window_bounds = array<i64: 8, 128>}]} {
    %c0 = arith.constant 0 : index
    %c0_0 = arith.constant 0 : index
    %0 = vector.load %arg3[%c0, %c0_0] : memref<8x128xf32, #tpu.memory_space<vmem>>, vector<8x128xf32>
    %c0_1 = arith.constant 0 : index
    %1 = memref.load %arg1[%c0_1] : memref<2xf32, #tpu.memory_space<smem>>
    %c0_2 = arith.constant 0 : index
    %2 = memref.load %arg2[%c0_2] : memref<2xf32, #tpu.memory_space<smem>>
    %3 = arith.truncf %0 : vector<8x128xf32> to vector<8x128xbf16>
    %c0_3 = arith.constant 0 : index
    %c0_4 = arith.constant 0 : index
    %4 = vector.load %arg4[%c0_3, %c0_4] : memref<128x256xbf16, #tpu.memory_space<vmem>>, vector<128x256xbf16>
    %cst = arith.constant dense<0.000000e+00> : vector<8x256xf32>
    %5 = tpu.matmul %3, %4, %cst {dimension_numbers = #tpu.dot_dimension_numbers<[1], [0], [0], [1], [0, 0, 1, 1], [], []>} : vector<8x128xbf16>, vector<128x256xbf16>, vector<8x256xf32> -> vector<8x256xf32>
    %c0_5 = arith.constant 0 : index
    %c0_6 = arith.constant 0 : index
    %6 = vector.load %arg5[%c0_5, %c0_6] : memref<1x256xf32, #tpu.memory_space<vmem>>, vector<1x256xf32>
    %7 = vector.broadcast %6 : vector<1x256xf32> to vector<8x256xf32>
    %8 = arith.addf %5, %7 : vector<8x256xf32>
    %9 = vector.extract_strided_slice %8 {offsets = [0, 0], sizes = [8, 128], strides = [1, 1]} : vector<8x256xf32> to vector<8x128xf32>
    %10 = vector.broadcast %1 : f32 to vector<8x128xf32>
    %11 = arith.mulf %10, %9 : vector<8x128xf32>
    %12 = math.tanh %11 : vector<8x128xf32>
    %13 = vector.extract_strided_slice %8 {offsets = [0, 128], sizes = [8, 128], strides = [1, 1]} : vector<8x256xf32> to vector<8x128xf32>
    %14 = arith.truncf %12 : vector<8x128xf32> to vector<8x128xbf16>
    %c0_7 = arith.constant 0 : index
    %c0_8 = arith.constant 0 : index
    %15 = vector.load %arg6[%c0_7, %c0_8] : memref<128x128xbf16, #tpu.memory_space<vmem>>, vector<128x128xbf16>
    %cst_9 = arith.constant dense<0.000000e+00> : vector<8x128xf32>
    %16 = tpu.matmul %14, %15, %cst_9 {dimension_numbers = #tpu.dot_dimension_numbers<[1], [0], [0], [1], [0, 0, 1, 1], [], []>} : vector<8x128xbf16>, vector<128x128xbf16>, vector<8x128xf32> -> vector<8x128xf32>
    %c0_10 = arith.constant 0 : index
    %c0_11 = arith.constant 0 : index
    %17 = vector.load %arg7[%c0_10, %c0_11] : memref<1x128xf32, #tpu.memory_space<vmem>>, vector<1x128xf32>
    %18 = vector.broadcast %17 : vector<1x128xf32> to vector<8x128xf32>
    %19 = arith.addf %16, %18 : vector<8x128xf32>
    %20 = vector.broadcast %2 : f32 to vector<8x128xf32>
    %21 = arith.mulf %20, %19 : vector<8x128xf32>
    %cst_12 = arith.constant 1.000000e+00 : f32
    %22 = arith.subf %cst_12, %2 : f32
    %23 = vector.broadcast %22 : f32 to vector<8x128xf32>
    %24 = arith.mulf %23, %13 : vector<8x128xf32>
    %25 = arith.addf %21, %24 : vector<8x128xf32>
    %26 = vector.broadcast %1 : f32 to vector<8x128xf32>
    %27 = arith.mulf %26, %25 : vector<8x128xf32>
    %28 = math.tanh %27 : vector<8x128xf32>
    %c1 = arith.constant 1 : index
    %29 = memref.load %arg1[%c1] : memref<2xf32, #tpu.memory_space<smem>>
    %c1_13 = arith.constant 1 : index
    %30 = memref.load %arg2[%c1_13] : memref<2xf32, #tpu.memory_space<smem>>
    %31 = arith.truncf %28 : vector<8x128xf32> to vector<8x128xbf16>
    %c0_14 = arith.constant 0 : index
    %c0_15 = arith.constant 0 : index
    %32 = vector.load %arg8[%c0_14, %c0_15] : memref<128x256xbf16, #tpu.memory_space<vmem>>, vector<128x256xbf16>
    %cst_16 = arith.constant dense<0.000000e+00> : vector<8x256xf32>
    %33 = tpu.matmul %31, %32, %cst_16 {dimension_numbers = #tpu.dot_dimension_numbers<[1], [0], [0], [1], [0, 0, 1, 1], [], []>} : vector<8x128xbf16>, vector<128x256xbf16>, vector<8x256xf32> -> vector<8x256xf32>
    %c0_17 = arith.constant 0 : index
    %c0_18 = arith.constant 0 : index
    %34 = vector.load %arg9[%c0_17, %c0_18] : memref<1x256xf32, #tpu.memory_space<vmem>>, vector<1x256xf32>
    %35 = vector.broadcast %34 : vector<1x256xf32> to vector<8x256xf32>
    %36 = arith.addf %33, %35 : vector<8x256xf32>
    %37 = vector.extract_strided_slice %36 {offsets = [0, 0], sizes = [8, 128], strides = [1, 1]} : vector<8x256xf32> to vector<8x128xf32>
    %38 = vector.broadcast %29 : f32 to vector<8x128xf32>
    %39 = arith.mulf %38, %37 : vector<8x128xf32>
    %40 = math.tanh %39 : vector<8x128xf32>
    %41 = vector.extract_strided_slice %36 {offsets = [0, 128], sizes = [8, 128], strides = [1, 1]} : vector<8x256xf32> to vector<8x128xf32>
    %42 = arith.truncf %40 : vector<8x128xf32> to vector<8x128xbf16>
    %c0_19 = arith.constant 0 : index
    %c0_20 = arith.constant 0 : index
    %43 = vector.load %arg10[%c0_19, %c0_20] : memref<128x128xbf16, #tpu.memory_space<vmem>>, vector<128x128xbf16>
    %cst_21 = arith.constant dense<0.000000e+00> : vector<8x128xf32>
    %44 = tpu.matmul %42, %43, %cst_21 {dimension_numbers = #tpu.dot_dimension_numbers<[1], [0], [0], [1], [0, 0, 1, 1], [], []>} : vector<8x128xbf16>, vector<128x128xbf16>, vector<8x128xf32> -> vector<8x128xf32>
    %c0_22 = arith.constant 0 : index
    %c0_23 = arith.constant 0 : index
    %45 = vector.load %arg11[%c0_22, %c0_23] : memref<1x128xf32, #tpu.memory_space<vmem>>, vector<1x128xf32>
    %46 = vector.broadcast %45 : vector<1x128xf32> to vector<8x128xf32>
    %47 = arith.addf %44, %46 : vector<8x128xf32>
    %48 = vector.broadcast %30 : f32 to vector<8x128xf32>
    %49 = arith.mulf %48, %47 : vector<8x128xf32>
    %cst_24 = arith.constant 1.000000e+00 : f32
    %50 = arith.subf %cst_24, %30 : f32
    %51 = vector.broadcast %50 : f32 to vector<8x128xf32>
    %52 = arith.mulf %51, %41 : vector<8x128xf32>
    %53 = arith.addf %49, %52 : vector<8x128xf32>
    %54 = vector.broadcast %29 : f32 to vector<8x128xf32>
    %55 = arith.mulf %54, %53 : vector<8x128xf32>
    %56 = math.tanh %55 : vector<8x128xf32>
    %57 = arith.truncf %56 : vector<8x128xf32> to vector<8x128xbf16>
    %c0_25 = arith.constant 0 : index
    %c0_26 = arith.constant 0 : index
    %58 = vector.load %arg12[%c0_25, %c0_26] : memref<128x128xbf16, #tpu.memory_space<vmem>>, vector<128x128xbf16>
    %cst_27 = arith.constant dense<0.000000e+00> : vector<8x128xf32>
    %59 = tpu.matmul %57, %58, %cst_27 {dimension_numbers = #tpu.dot_dimension_numbers<[1], [0], [0], [1], [0, 0, 1, 1], [], []>} : vector<8x128xbf16>, vector<128x128xbf16>, vector<8x128xf32> -> vector<8x128xf32>
    %c0_28 = arith.constant 0 : index
    %c0_29 = arith.constant 0 : index
    %60 = vector.load %arg13[%c0_28, %c0_29] : memref<1x128xf32, #tpu.memory_space<vmem>>, vector<1x128xf32>
    %61 = vector.broadcast %60 : vector<1x128xf32> to vector<8x128xf32>
    %62 = arith.addf %59, %61 : vector<8x128xf32>
    %c0_30 = arith.constant 0 : index
    %c0_31 = arith.constant 0 : index
    %63 = vector.load %arg14[%c0_30, %c0_31] : memref<8x128xf32, #tpu.memory_space<vmem>>, vector<8x128xf32>
    tpu.vector_store %arg14[%c0_30, %c0_31], %62 {strides = array<i32>} : memref<8x128xf32, #tpu.memory_space<vmem>>, vector<8x128xf32>,
    return
  }
  func.func @transform_0(%arg0: i32, %arg1: memref<2xf32, #tpu.memory_space<smem>>, %arg2: memref<2xf32, #tpu.memory_space<smem>>) -> (i32, i32) {
    %c0_i32 = arith.constant 0 : i32
    %c0_i32_0 = arith.constant 0 : i32
    return %arg0, %c0_i32 : i32, i32
  }
  func.func @transform_1(%arg0: i32, %arg1: memref<2xf32, #tpu.memory_space<smem>>, %arg2: memref<2xf32, #tpu.memory_space<smem>>) -> (i32, i32) {
    %c0_i32 = arith.constant 0 : i32
    %c0_i32_0 = arith.constant 0 : i32
    %c0_i32_1 = arith.constant 0 : i32
    return %c0_i32, %c0_i32_0 : i32, i32
  }
  func.func @transform_2(%arg0: i32, %arg1: memref<2xf32, #tpu.memory_space<smem>>, %arg2: memref<2xf32, #tpu.memory_space<smem>>) -> (i32, i32) {
    %c0_i32 = arith.constant 0 : i32
    %c0_i32_0 = arith.constant 0 : i32
    %c0_i32_1 = arith.constant 0 : i32
    return %c0_i32, %c0_i32_0 : i32, i32
  }
  func.func @transform_3(%arg0: i32, %arg1: memref<2xf32, #tpu.memory_space<smem>>, %arg2: memref<2xf32, #tpu.memory_space<smem>>) -> (i32, i32) {
    %c0_i32 = arith.constant 0 : i32
    %c0_i32_0 = arith.constant 0 : i32
    %c0_i32_1 = arith.constant 0 : i32
    return %c0_i32, %c0_i32_0 : i32, i32
  }
  func.func @transform_4(%arg0: i32, %arg1: memref<2xf32, #tpu.memory_space<smem>>, %arg2: memref<2xf32, #tpu.memory_space<smem>>) -> (i32, i32) {
    %c0_i32 = arith.constant 0 : i32
    %c0_i32_0 = arith.constant 0 : i32
    %c0_i32_1 = arith.constant 0 : i32
    return %c0_i32, %c0_i32_0 : i32, i32
  }
  func.func @transform_5(%arg0: i32, %arg1: memref<2xf32, #tpu.memory_space<smem>>, %arg2: memref<2xf32, #tpu.memory_space<smem>>) -> (i32, i32) {
    %c0_i32 = arith.constant 0 : i32
    %c0_i32_0 = arith.constant 0 : i32
    %c0_i32_1 = arith.constant 0 : i32
    return %c0_i32, %c0_i32_0 : i32, i32
  }
  func.func @transform_6(%arg0: i32, %arg1: memref<2xf32, #tpu.memory_space<smem>>, %arg2: memref<2xf32, #tpu.memory_space<smem>>) -> (i32, i32) {
    %c0_i32 = arith.constant 0 : i32
    %c0_i32_0 = arith.constant 0 : i32
    %c0_i32_1 = arith.constant 0 : i32
    return %c0_i32, %c0_i32_0 : i32, i32
  }
  func.func @transform_7(%arg0: i32, %arg1: memref<2xf32, #tpu.memory_space<smem>>, %arg2: memref<2xf32, #tpu.memory_space<smem>>) -> (i32, i32) {
    %c0_i32 = arith.constant 0 : i32
    %c0_i32_0 = arith.constant 0 : i32
    %c0_i32_1 = arith.constant 0 : i32
    return %c0_i32, %c0_i32_0 : i32, i32
  }
  func.func @transform_8(%arg0: i32, %arg1: memref<2xf32, #tpu.memory_space<smem>>, %arg2: memref<2xf32, #tpu.memory_space<smem>>) -> (i32, i32) {
    %c0_i32 = arith.constant 0 : i32
    %c0_i32_0 = arith.constant 0 : i32
    %c0_i32_1 = arith.constant 0 : i32
    return %c0_i32, %c0_i32_0 : i32, i32
  }
  func.func @transform_9(%arg0: i32, %arg1: memref<2xf32, #tpu.memory_space<smem>>, %arg2: memref<2xf32, #tpu.memory_space<smem>>) -> (i32, i32) {
    %c0_i32 = arith.constant 0 : i32
    %c0_i32_0 = arith.constant 0 : i32
    %c0_i32_1 = arith.constant 0 : i32
    return %c0_i32, %c0_i32_0 : i32, i32
  }
  func.func @transform_10(%arg0: i32, %arg1: memref<2xf32, #tpu.memory_space<smem>>, %arg2: memref<2xf32, #tpu.memory_space<smem>>) -> (i32, i32) {
    %c0_i32 = arith.constant 0 : i32
    %c0_i32_0 = arith.constant 0 : i32
    %c0_i32_1 = arith.constant 0 : i32
    return %c0_i32, %c0_i32_0 : i32, i32
  }
  func.func @transform_11(%arg0: i32, %arg1: memref<2xf32, #tpu.memory_space<smem>>, %arg2: memref<2xf32, #tpu.memory_space<smem>>) -> (i32, i32) {
    %c0_i32 = arith.constant 0 : i32
    %c0_i32_0 = arith.constant 0 : i32
    return %arg0, %c0_i32 : i32, i32
  }
}

</mosaic_0001>

<bundles_post_ra>
// kernel: adaptive_resnet_forward.1
= control target key start
LH: loop header
LB: loop body
LE: loop exit
PB: predicated region body
PF: predicated region fallthrough
CT: control target
= control target key end

     0   :  { %s1382_s0 = inlined_call_operand.vmem [shape: f32[2], index: 0, kind: input, shape index: {}]   ;;  %s1383_s2 = inlined_call_operand.vmem [shape: f32[8,128], index: 2, kind: input, shape index: {}]   ;;  %s1384_s3 = inlined_call_operand.hbm [shape: bf16[128,256], index: 3, kind: input, shape index: {}]   ;;  %s1385_s4 = inlined_call_operand.vmem [shape: f32[1,256], index: 4, kind: input, shape index: {}]   ;;  %s1386_s5 = inlined_call_operand.hbm [shape: bf16[128,128], index: 5, kind: input, shape index: {}]   ;;  %s1387_s6 = inlined_call_operand.vmem [shape: f32[1,128], index: 6, kind: input, shape index: {}]   ;;  %s1388_s7 = inlined_call_operand.hbm [shape: bf16[128,256], index: 7, kind: input, shape index: {}]   ;;  %s1389_s8 = inlined_call_operand.vmem [shape: f32[1,256], index: 8, kind: input, shape index: {}]   ;;  %s1390_s9 = inlined_call_operand.hbm [shape: bf16[128,128], index: 9, kind: input, shape index: {}]   ;;  %s1391_s10 = inlined_call_operand.vmem [shape: f32[1,128], index: 10, kind: input, shape index: {}]   ;;  %s1392_s11 = inlined_call_operand.hbm [shape: bf16[128,128], index: 11, kind: input, shape index: {}]   ;;  %s1393_s12 = inlined_call_operand.vmem [shape: f32[1,128], index: 12, kind: input, shape index: {}]   ;;  %s1394_s13 = inlined_call_operand.hbm [shape: f32[8,128], index: 13, kind: output, shape index: {}]   ;;  %s1395_s1 = inlined_call_operand.vmem [shape: f32[2], index: 1, kind: input, shape index: {}]  }
   0x1   :  { %s18_s27 = sshll.u32 %s1382_s0, 4  ;;  %s22_s30 = sshll.u32 %s1395_s1, 4  ;;  %s19_s27 = int_to_ptr.vmem [resolvable:$true] %s18_s27  ;;  %s23_s30 = int_to_ptr.vmem [resolvable:$true] %s22_s30 }
   0x2   :  { %s1044_s14 = scalar_lea.vmem %s19_s27, 16  ;;  %p1049_p1 = scmp.lt.s32.totalorder %s19_s27, %s19_s27 }
   0x3   :  { %p1045_p0 = scmp.ne.s32.totalorder %s19_s27, %s1044_s14  ;;  %p1050_p2 = scmp.lt.s32.totalorder %s1044_s14, %s1044_s14 }
   0x5   :  { %p1051_p3 = por %p1050_p2, %p1049_p1 }
   0x7   :  { %p1052_p4 = pnand %p1051_p3, %p1045_p0 }
   0x9   :  { %1055 = shalt.err (!%p1052_p4)  }
   0xa   :  { %s1198_s15 = smov [#allocation3]   ;;  %s1056_s16 = scalar_lea.vmem %s23_s30, 16 }
   0xb   :  { %21 = dma.vmem_to_smem %s19_s27, 16, %s1198_s15, [#allocation2] }
   0xc   :  { %p1057_p5 = scmp.ne.s32.totalorder %s23_s30, %s1056_s16  ;;  %p1061_p6 = scmp.lt.s32.totalorder %s23_s30, %s23_s30 }
   0xd   :  { %p1062_p7 = scmp.lt.s32.totalorder %s1056_s16, %s1056_s16 }
   0xf   :  { %p1063_p8 = por %p1062_p7, %p1061_p6 }
  0x11   :  { %p1064_p9 = pnand %p1063_p8, %p1057_p5 }
  0x13   :  { %1067 = shalt.err (!%p1064_p9)  }
  0x14   :  { %s1199_s0 = smov [#allocation4]  }
  0x15   :  { %25 = dma.vmem_to_smem %s23_s30, 16, %s1199_s0, [#allocation2] }
  0x16   :  { %1188 = dma.done.wait [#allocation2], 32 }
  0x17   :  { %1189 = vsyncadd [#allocation2], 4294967264 }
  0x18   :  { %27 = sfence }
  0x19   :  { %28 = vsyncpa [#allocation6], 0 }
  0x1a   :  { %29 = vsyncpa [#allocation9], 0 }
  0x1b   :  { %30 = vsyncpa [#allocation12], 0 }
  0x1c   :  { %31 = vsyncpa [#allocation7], 0  ;;  %s1200_s1 = smov [#allocation8]  }
  0x1d   :  { %s53_s17 = sshll.u32 %s1200_s1, 4  ;;  %s54_s17 = int_to_ptr.vmem [resolvable:$true] %s53_s17 }
  0x1e   :  { %s1076_s18 = scalar_lea.vmem %s54_s17, 1024  ;;  %p1081_p11 = scmp.lt.s32.totalorder %s54_s17, %s54_s17 }
  0x1f   :  { %p1077_p10 = scmp.ne.s32.totalorder %s54_s17, %s1076_s18  ;;  %p1082_p12 = scmp.lt.s32.totalorder %s1076_s18, %s1076_s18 }
  0x21   :  { %p1083_p13 = por %p1082_p12, %p1081_p11 }
  0x23   :  { %p1084_p0 = pnand %p1083_p13, %p1077_p10 }
  0x25   :  { %1087 = shalt.err (!%p1084_p0)
}
  0x26   :  { %s1201_s19 = smov 64   ;;  %s1202_s20 = smov 4  }
  0x27   :  { %59 = dma.hbm_to_vmem [thread:$0]  %s1386_s5, 1024, %s54_s17, [#allocation9], %s1201_s19, %s1201_s19, %s1202_s20  }
  0x28   :  { %s1203_s23 = smov [#allocation11]   ;;  %s1204_s25 = smov [#allocation5]  }
  0x29   :  { %s81_s24 = sshll.u32 %s1203_s23, 4  ;;  %s39_s26 = sshll.u32 %s1204_s25, 4  ;;  %s82_s24 = int_to_ptr.vmem [resolvable:$true] %s81_s24  ;;  %s40_s26 = int_to_ptr.vmem [resolvable:$true] %s39_s26 }
  0x2a   :  { %s1096_s27 = scalar_lea.vmem %s82_s24, 1024  ;;  %p1101_p2 = scmp.lt.s32.totalorder %s82_s24, %s82_s24 }
  0x2b   :  { %p1097_p1 = scmp.ne.s32.totalorder %s82_s24, %s1096_s27  ;;  %p1102_p3 = scmp.lt.s32.totalorder %s1096_s27, %s1096_s27 }
  0x2d   :  { %p1103_p4 = por %p1102_p3, %p1101_p2 }
  0x2f   :  { %p1104_p5 = pnand %p1103_p4, %p1097_p1 }
  0x31   :  { %1107 = shalt.err (!%p1104_p5)
}
  0x32   :  { %87 = dma.hbm_to_vmem [thread:$0]  %s1390_s9, 1024, %s82_s24, [#allocation12], %s1201_s19, %s1201_s19, %s1202_s20  }
  0x33   :  { %s1116_s5 = scalar_lea.vmem %s40_s26, 2048  ;;  %p1121_p7 = scmp.lt.s32.totalorder %s40_s26, %s40_s26 }
  0x34   :  { %p1117_p6 = scmp.ne.s32.totalorder %s40_s26, %s1116_s5  ;;  %p1122_p8 = scmp.lt.s32.totalorder %s1116_s5, %s1116_s5 }
  0x36   :  { %p1123_p9 = por %p1122_p8, %p1121_p7 }
  0x38   :  { %p1124_p10 = pnand %p1123_p9, %p1117_p6 }
  0x3a   :  { %1127 = shalt.err (!%p1124_p10)
}
  0x3b   :  { %s1205_s30 = smov 128   ;;  %s1206_s14 = smov 8  }
  0x3c   :  { %45 = dma.hbm_to_vmem [thread:$0]  %s1384_s3, 2048, %s40_s26, [#allocation6], %s1205_s30, %s1205_s30, %s1206_s14  }
  0x3d   :  { %s1207_s0 = smov [#allocation10]   ;;  %s1208_s17 = smov [#allocation13]  }
  0x3e   :  { %s67_s1 = sshll.u32 %s1207_s0, 4  ;;  %s95_s18 = sshll.u32 %s1208_s17, 4  ;;  %s68_s1 = int_to_ptr.vmem [resolvable:$true] %s67_s1  ;;  %s96_s18 = int_to_ptr.vmem [resolvable:$true] %s95_s18 }
  0x3f   :  { %s1136_s9 = scalar_lea.vmem %s68_s1, 2048  ;;  %p1141_p12 = scmp.lt.s32.totalorder %s68_s1, %s68_s1 }
  0x40   :  { %p1137_p11 = scmp.ne.s32.totalorder %s68_s1, %s1136_s9  ;;  %p1142_p13 = scmp.lt.s32.totalorder %s1136_s9, %s1136_s9 }
  0x42   :  { %p1143_p0 = por %p1142_p13, %p1141_p12 }
  0x44   :  { %p1144_p1 = pnand %p1143_p0, %p1137_p11 }
  0x46   :  { %1147 = shalt.err (!%p1144_p1)
}
  0x47   :  { %73 = dma.hbm_to_vmem [thread:$0]  %s1388_s7, 2048, %s68_s1, [#allocation9], %s1205_s30, %s1205_s30, %s1206_s14  }
  0x48   :  { %s1156_s23 = scalar_lea.vmem %s96_s18, 1024  ;;  %p1161_p3 = scmp.lt.s32.totalorder %s96_s18, %s96_s18 }
  0x49   :  { %p1157_p2 = scmp.ne.s32.totalorder %s96_s18, %s1156_s23  ;;  %p1162_p4 = scmp.lt.s32.totalorder %s1156_s23, %s1156_s23 }
  0x4b   :  { %p1163_p5 = por %p1162_p4, %p1161_p3 }
  0x4d   :  { %p1164_p6 = pnand %p1163_p5, %p1157_p2 }
  0x4f   :  { %1167 = shalt.err (!%p1164_p6)
}
  0x50   :  { %101 = dma.hbm_to_vmem [thread:$0]  %s1392_s11, 1024, %s96_s18, [#allocation12], %s1201_s19, %s1201_s19, %s1202_s20  }
  0x51   :  { %1190 = dma.done.wait [#allocation6], 2048  }
  0x52   :  { %1191 = vsyncadd [#allocation6], 4294965248 }
  0x53   :  { %1192 = dma.done.wait [#allocation9], 3072  }
  0x54   :  { %1193 = vsyncadd [#allocation9], 4294964224 }
  0x55   :  { %1194 = dma.done.wait [#allocation12], 2048  }
  0x56   :  { %1195 = vsyncadd [#allocation12], 4294965248  ;;  %v1209_v0 = vmov 0   ;;  %v1210_v1 = vmov 0.0   ;;  %v964_v2 = vld [vmem:[#allocation5 + $0x74] ss:$8 sps:$4 sm:$0xff]   ;;  %v142_v32 = vlaneseq }
  0x57   :  { %264 = vmatprep.mubr.bf16.mxu0 %v1209_v0  ;;  %889 = vmatprep.subr.bf16.mxu1 %v1210_v1  ;;  %v966_v3 = vld [vmem:[#allocation5 + $0x70] ss:$8 sps:$4 sm:$0xff]   ;;  %v967_v4 = vld [vmem:[#allocation5 + $0x64] ss:$8 sps:$4 sm:$0xff]   ;;  %v969_v5 = vld [vmem:[#allocation5 + $0x60] ss:$8 sps:$4 sm:$0xff]  }
  0x58   :  { %232 = vmatprep.subr.bf16.mxu0 %v964_v2  ;;  %v970_v6 = vld [vmem:[#allocation5 + $0x54] ss:$8 sps:$4 sm:$0xff]   ;;  %v972_v7 = vld [vmem:[#allocation5 + $0x50] ss:$8 sps:$4 sm:$0xff]   ;;  %v973_v8 = vld [vmem:[#allocation5 + $0x44] ss:$8 sps:$4 sm:$0xff]  }
  0x59   :  { %233 = vmatpush1.bf16.msra.mxu0 %v966_v3  ;;  %v975_v9 = vld [vmem:[#allocation5 + $0x40] ss:$8 sps:$4 sm:$0xff]   ;;  %v988_v10 = vld [vmem:[#allocation8 + $0x38] sm:$0xff]   ;;  %v989_v13 = vld [vmem:[#allocation8 + $0x30] sm:$0xff]   ;;  %vm1211_vm0 = vmmov 0   ;;  %v1327_v33 = vshrl.u32 %v142_v32, 7 }
  0x5a   :  { %234 = vmatprep.subr.bf16.mxu0 %v967_v4  ;;  %v976_v11 = vld [vmem:[#allocation5 + $0x34] ss:$8 sps:$4 sm:$0xff]   ;;  %v978_v12 = vld [vmem:[#allocation5 + $0x30] ss:$8 sps:$4 sm:$0xff]   ;;  %890 = vmatpush3.bf16.msra.mxu1 %v988_v10  ;;  %v979_v14 = vld [vmem:[#allocation5 + $0x24] ss:$8 sps:$4 sm:$0xff]  }
  0x5b   :  { %891 = vmatprep.subr.bf16.mxu1 %v1210_v1  ;;  %v990_v15 = vld [vmem:[#allocation8 + $0x28] sm:$0xff]   ;;  %v982_v17 = vld [vmem:[#allocation5 + $0x14] ss:$8 sps:$4 sm:$0xff]   ;;  %v984_v18 = vld [vmem:[#allocation5 + $0x10] ss:$8 sps:$4 sm:$0xff]   ;;  %905 = vmatprep.mubr.msk.bf16.mxu1 %vm1211_vm0, %v1210_v1  ;;  %v144_v34 = vsub.s32 0, %v1327_v33 }
  0x5c   :  { %v981_v16 = vld [vmem:[#allocation5 + $0x20] ss:$8 sps:$4 sm:$0xff]   ;;  %v985_v19 = vld [vmem:[#allocation5 + $0x4] ss:$8 sps:$4 sm:$0xff]   ;;  %v992_v24 = vld [vmem:[#allocation8 + $0x18] sm:$0xff]   ;;  %v148_v61 = vsub.s32 1, %v1327_v33 }
  0x5d   :  { %235 = vmatpush1.bf16.msra.mxu0 %v969_v5  ;;  %v987_v20 = vld [vmem:[#allocation5] ss:$8 sps:$4 sm:$0xff]   ;;  %v993_v25 = vld [vmem:[#allocation8 + $0x10] sm:$0xff]   ;;  %v1001_v30 = vld [vmem:[#allocation10 + $0x64] ss:$8 sps:$4 sm:$0xff]  }
  0x5e   :  { %236 = vmatprep.subr.bf16.mxu0 %v970_v6  ;;  %892 = vmatpush3.bf16.msra.mxu1 %v989_v13  ;;  %v120_v21 = vld [vmem:[%s1383_s2] sm:$0xff]  ;;  %v994_v26 = vld [vmem:[#allocation8 + $0x8] sm:$0xff]   ;;  %v996_v28 = vld [vmem:[#allocation10 + $0x70] ss:$8 sps:$4 sm:$0xff]   ;;  %s1329_s2 = sld [smem:[#allocation3]] }
  0x5f   :  { %893 = vmatprep.subr.bf16.mxu1 %v1210_v1  ;;  %v123_v22 = vpack.c.bf16 %v120_v21, %v120_v21  ;;  %v991_v23 = vld [vmem:[#allocation8 + $0x20] sm:$0xff]   ;;  %v998_v29 = vld [vmem:[#allocation10 + $0x74] ss:$8 sps:$4 sm:$0xff]   ;;  %v1002_v47 = vld [vmem:[#allocation10 + $0x50] ss:$8 sps:$4 sm:$0xff]  }
  0x60   :  { %v995_v27 = vld [vmem:[#allocation8] sm:$0xff]   ;;  %v1004_v46 = vld [vmem:[#allocation10 + $0x54] ss:$8 sps:$4 sm:$0xff]   ;;  %v1008_v51 = vld [vmem:[#allocation10 + $0x30] ss:$8 sps:$4 sm:$0xff]  }
  0x61   :  { %237 = vmatpush1.bf16.msra.mxu0 %v972_v7  ;;  %v999_v31 = vld [vmem:[#allocation10 + $0x60] ss:$8 sps:$4 sm:$0xff]   ;;  %v1007_v48 = vld [vmem:[#allocation10 + $0x44] ss:$8 sps:$4 sm:$0xff]   ;;  %v1010_v50 = vld [vmem:[#allocation10 + $0x34] ss:$8 sps:$4 sm:$0xff]  }
  0x62   :  { %238 = vmatprep.subr.bf16.mxu0 %v973_v8  ;;  %894 = vmatpush3.bf16.msra.mxu1 %v990_v15  ;;  %v140_v35 = vld [vmem:[%s1385_s4] sm:$0x3]  ;;  %v1013_v52 = vld [vmem:[#allocation10 + $0x24] ss:$8 sps:$4 sm:$0xff]   ;;  %v1016_v54 = vld [vmem:[#allocation10 + $0x14] ss:$8 sps:$4 sm:$0xff]  }
  0x63   :  { %895 = vmatprep.subr.bf16.mxu1 %v1210_v1  ;;  %v145_v36 = vrot.slane %v140_v35, %v144_v34  ;;  %v1005_v49 = vld [vmem:[#allocation10 + $0x40] ss:$8 sps:$4 sm:$0xff]   ;;  %v1014_v55 = vld [vmem:[#allocation10 + $0x10] ss:$8 sps:$4 sm:$0xff]   ;;  %v1019_v56 = vld [vmem:[#allocation10 + $0x4] ss:$8 sps:$4 sm:$0xff]   ;;  %v149_v62 = vrot.slane %v140_v35, %v148_v61 }
  0x64   :  { %v273_v38 = vstv %s1329_s2  ;;  %v1011_v53 = vld [vmem:[#allocation10 + $0x20] ss:$8 sps:$4 sm:$0xff]   ;;  %v1020_v58 = vld [vmem:[#allocation11 + $0x38] sm:$0xff]   ;;  %v1021_v59 = vld [vmem:[#allocation11 + $0x30] sm:$0xff]   ;;  %s122_s4 = sld [smem:[#allocation4]] }
  0x65   :  { %239 = vmatpush1.bf16.msra.mxu0 %v975_v9  ;;  %v1017_v57 = vld [vmem:[#allocation10] ss:$8 sps:$4 sm:$0xff]   ;;  %v1029_v21 = vld [vmem:[#allocation13 + $0x30] sm:$0xff]  }
  0x66   :  { %240 = vmatprep.subr.bf16.mxu0 %v976_v11  ;;  %896 = vmatpush3.bf16.msra.mxu1 %v991_v23  ;;  %v1022_v60 = vld [vmem:[#allocation11 + $0x28] sm:$0xff]   ;;  %v817_v63 = vld [vmem:[%s1387_s6] ss:$0 sm:$0xff]  ;;  %s1358_s6 = sld [smem:[#allocation3 + $0x1]] }
  0x67   :  { %897 = vmatprep.subr.bf16.mxu1 %v1210_v1  ;;  %v1023_v15 = vld [vmem:[#allocation11 + $0x20] sm:$0xff]   ;;  %v1030_v35 = vld [vmem:[#allocation13 + $0x28] sm:$0xff]  }
  0x69   :  { %241 = vmatpush1.bf16.msra.mxu0 %v978_v12 }
  0x6a   :  { %242 = vmatprep.subr.bf16.mxu0 %v979_v14  ;;  %898 = vmatpush3.bf16.msra.mxu1 %v992_v24  ;;  %s390_s25 = ssub.f32 1.0, %s122_s4  ;;  %v388_v4 = vstv %s122_s4 }
  0x6b   :  { %899 = vmatprep.subr.bf16.mxu1 %v1210_v1 }
  0x6c   :  { %v391_v2 = vstv %s390_s25 }
  0x6d   :  { %243 = vmatpush1.bf16.msra.mxu0 %v981_v16  ;;  %v1024_v16 = vld [vmem:[#allocation11 + $0x18] sm:$0xff]  }
  0x6e   :  { %244 = vmatprep.subr.bf16.mxu0 %v982_v17  ;;  %900 = vmatpush3.bf16.msra.mxu1 %v993_v25  ;;  %v1025_v17 = vld [vmem:[#allocation11 + $0x10] sm:$0xff]   ;;  %v548_v25 = vstv %s1358_s6 }
  0x6f   :  { %901 = vmatprep.subr.bf16.mxu1 %v1210_v1 }
  0x71   :  { %245 = vmatpush1.bf16.msra.mxu0 %v984_v18  ;;  %v1026_v18 = vld [vmem:[#allocation11 + $0x8] sm:$0xff]  }
  0x72   :  { %246 = vmatprep.subr.bf16.mxu0 %v985_v19  ;;  %902 = vmatpush3.bf16.msra.mxu1 %v994_v26  ;;  %v1027_v19 = vld [vmem:[#allocation11] sm:$0xff]  }
  0x73   :  { %903 = vmatprep.subr.bf16.mxu1 %v1210_v1 }
  0x75   :  { %247 = vmatpush1.bf16.msra.mxu0 %v987_v20  ;;  %v1028_v20 = vld [vmem:[#allocation13 + $0x38] sm:$0xff]  }
  0x76   :  { %904 = vmatpush3.bf16.msra.mxu1 %v995_v27  ;;  %507 = vmatprep.subr.bf16.mxu0 %v998_v29 }
  0x77   :  { %909 = vmatprep.subr.bf16.mxu1 %v1210_v1 }
  0x78   :  { %265 = vmatmul.mubr.bf16.vlgmr.msra.gmra.mxu0 %v123_v22  ;;  %v415_v22 = vld [vmem:[%s1389_s8] sm:$0x3]  ;;  %s827_s8 = sld [smem:[#allocation4 + $0x1]] }
  0x79   :  { %539 = vmatprep.mubr.bf16.mxu0 %v1209_v0  ;;  %508 = vmatpush1.bf16.msra.mxu0 %v996_v28  ;;  %v420_v23 = vrot.slane %v415_v22, %v144_v34  ;;  %v1032_v34 = vld [vmem:[#allocation13 + $0x18] sm:$0xff]  }
  0x7a   :  { %509 = vmatprep.subr.bf16.mxu0 %v1001_v30 }
  0x7d   :  { %510 = vmatpush1.bf16.msra.mxu0 %v999_v31 }
  0x7e   :  { %511 = vmatprep.subr.bf16.mxu0 %v1004_v46  ;;  %s665_s5 = ssub.f32 1.0, %s827_s8 }
  0x81   :  { %512 = vmatpush1.bf16.msra.mxu0 %v1002_v47 }
  0x82   :  { %513 = vmatprep.subr.bf16.mxu0 %v1007_v48 }
  0x85   :  { %514 = vmatpush1.bf16.msra.mxu0 %v1005_v49 }
  0x86   :  { %515 = vmatprep.subr.bf16.mxu0 %v1010_v50 }
  0x89   :  { %516 = vmatpush1.bf16.msra.mxu0 %v1008_v51 }
  0x8a   :  { %517 = vmatprep.subr.bf16.mxu0 %v1013_v52 }
  0x8d   :  { %518 = vmatpush1.bf16.msra.mxu0 %v1011_v53 }
  0x8e   :  { %519 = vmatprep.subr.bf16.mxu0 %v1016_v54  ;;  %v853_v54 = vld [vmem:[%s1393_s12] ss:$0 sm:$0xff] }
  0x91   :  { %520 = vmatpush1.bf16.msra.mxu0 %v1014_v55 }
  0x92   :  { %521 = vmatprep.subr.bf16.mxu0 %v1019_v56 }
  0x95   :  { %522 = vmatpush1.bf16.msra.mxu0 %v1017_v57 }
  0x96   :  { %929 = vmatprep.subr.bf16.mxu0 %v1210_v1 }
 0x138   :  { %v266_v37 = vpop.f32.mrf.mxu0 }
 0x139   :  { %v267_v39 = vadd.f32 %v266_v37, %v145_v36  ;;  %v1031_v36 = vld [vmem:[#allocation13 + $0x20] sm:$0xff]   ;;  %v1033_v37 = vld [vmem:[#allocation13 + $0x10] sm:$0xff]  }
 0x13a   :  { %v268_v40 = vpop.f32.mrf.mxu0 }
 0x13b   :  { %v274_v41 = vmul.f32 %v273_v38, %v267_v39  ;;  %v269_v0 = vadd.f32 %v268_v40, %v149_v62  ;;  %v1035_v39 = vld [vmem:[#allocation13] sm:$0xff]   ;;  %v424_v40 = vrot.slane %v415_v22, %v148_v61 }
 0x13c   :  { %v270_v42 = vpop.f32.mrf.mxu0 }
 0x13d   :  { %1036 = vtanh.f32 %v274_v41  ;;  %v392_v7 = vmul.f32 %v391_v2, %v269_v0  ;;  %v844_v41 = vld [vmem:[%s1391_s10] ss:$0 sm:$0xff]  ;;  %s1212_s10 = smov [#allocation14]  }
 0x13e   :  { %v271_v43 = vpop.f32.mrf.mxu0  ;;  %s790_s0 = sshll.u32 %s1212_s10, 4  ;;  %s791_s0 = int_to_ptr.vmem [resolvable:$true] %s790_s0 }
 0x13f   :  { %v666_v43 = vstv %s665_s5  ;;  %s1168_s1 = scalar_lea.vmem %s791_s0, 128  ;;  %p1173_p8 = scmp.lt.s32.totalorder %s791_s0, %s791_s0 }
 0x140   :  { %p1169_p7 = scmp.ne.s32.totalorder %s791_s0, %s1168_s1  ;;  %p1174_p9 = scmp.lt.s32.totalorder %s1168_s1, %s1168_s1 }
 0x142   :  { %p1175_p10 = por %p1174_p9, %p1173_p8 }
 0x144   :  { %p1176_p11 = pnand %p1175_p10, %p1169_p7 }
 0x14a   :  { %v1037_v44 = vpop.eup %1036 }
 0x14b   :  { %v276_v45 = vpack.c.bf16 %v1037_v44, %v1037_v44 }
 0x14d   :  { %906 = vmatmul.mubr.bf16.vlgmr.msra.gmra.mxu1 %v276_v45  ;;  %v663_v45 = vstv %s827_s8 }
 0x14e   :  { %925 = vmatprep.mubr.msk.bf16.mxu1 %vm1211_vm0, %v1210_v1  ;;  %910 = vmatpush3.bf16.msra.mxu1 %v1020_v58 }
 0x14f   :  { %911 = vmatprep.subr.bf16.mxu1 %v1210_v1 }
 0x152   :  { %912 = vmatpush3.bf16.msra.mxu1 %v1021_v59 }
 0x153   :  { %913 = vmatprep.subr.bf16.mxu1 %v1210_v1 }
 0x156   :  { %914 = vmatpush3.bf16.msra.mxu1 %v1022_v60 }
 0x157   :  { %915 = vmatprep.subr.bf16.mxu1 %v1210_v1 }
 0x15a   :  { %916 = vmatpush3.bf16.msra.mxu1 %v1023_v15 }
 0x15b   :  { %917 = vmatprep.subr.bf16.mxu1 %v1210_v1 }
 0x15e   :  { %918 = vmatpush3.bf16.msra.mxu1 %v1024_v16 }
 0x15f   :  { %919 = vmatprep.subr.bf16.mxu1 %v1210_v1 }
 0x162   :  { %920 = vmatpush3.bf16.msra.mxu1 %v1025_v17 }
 0x163   :  { %921 = vmatprep.subr.bf16.mxu1 %v1210_v1 }
 0x166   :  { %922 = vmatpush3.bf16.msra.mxu1 %v1026_v18 }
 0x167   :  { %923 = vmatprep.subr.bf16.mxu1 %v1210_v1 }
 0x16a   :  { %924 = vmatpush3.bf16.msra.mxu1 %v1027_v19 }
 0x20d   :  { %v382_v3 = vpop.f32.mrf.mxu1 }
 0x20e   :  { %v383_v5 = vadd.f32 %v817_v63, %v382_v3 }
 0x20f   :  { %v907_v6 = vpop.f32.mrf.mxu1 }
 0x210   :  { %v389_v8 = vmul.f32 %v388_v4, %v383_v5 }
 0x211   :  { %v385_v9 = vpop.f32.mrf.mxu1 }
 0x212   :  { %v393_v10 = vadd.f32 %v392_v7, %v389_v8 }
 0x213   :  { %v908_v11 = vpop.f32.mrf.mxu1 }
 0x214   :  { %v394_v12 = vmul.f32 %v393_v10, %v273_v38  ;;  %v1034_v38 = vld [vmem:[#allocation13 + $0x8] sm:$0xff]  }
 0x216   :  { %1038 = vtanh.f32 %v394_v12 }
 0x223   :  { %v1039_v13 = vpop.eup %1038 }
 0x224   :  { %v398_v14 = vpack.c.bf16 %v1039_v13, %v1039_v13 }
 0x226   :  { %540 = vmatmul.mubr.bf16.vlgmr.msra.gmra.mxu0 %v398_v14 }
 0x227   :  { %945 = vmatprep.mubr.msk.bf16.mxu0 %vm1211_vm0, %v1210_v1  ;;  %930 = vmatpush3.bf16.msra.mxu0 %v1028_v20 }
 0x228   :  { %931 = vmatprep.subr.bf16.mxu0 %v1210_v1 }
 0x22b   :  { %932 = vmatpush3.bf16.msra.mxu0 %v1029_v21 }
 0x22c   :  { %933 = vmatprep.subr.bf16.mxu0 %v1210_v1 }
 0x22f   :  { %934 = vmatpush3.bf16.msra.mxu0 %v1030_v35 }
 0x230   :  { %935 = vmatprep.subr.bf16.mxu0 %v1210_v1 }
 0x233   :  { %936 = vmatpush3.bf16.msra.mxu0 %v1031_v36 }
 0x234   :  { %937 = vmatprep.subr.bf16.mxu0 %v1210_v1 }
 0x237   :  { %938 = vmatpush3.bf16.msra.mxu0 %v1032_v34 }
 0x238   :  { %939 = vmatprep.subr.bf16.mxu0 %v1210_v1 }
 0x23b   :  { %940 = vmatpush3.bf16.msra.mxu0 %v1033_v37 }
 0x23c   :  { %941 = vmatprep.subr.bf16.mxu0 %v1210_v1 }
 0x23f   :  { %942 = vmatpush3.bf16.msra.mxu0 %v1034_v38 }
 0x240   :  { %943 = vmatprep.subr.bf16.mxu0 %v1210_v1 }
 0x243   :  { %944 = vmatpush3.bf16.msra.mxu0 %v1035_v39 }
 0x2e6   :  { %v541_v24 = vpop.f32.mrf.mxu0 }
 0x2e7   :  { %v542_v26 = vadd.f32 %v541_v24, %v420_v23 }
 0x2e8   :  { %v543_v27 = vpop.f32.mrf.mxu0 }
 0x2e9   :  { %v549_v28 = vmul.f32 %v548_v25, %v542_v26  ;;  %v544_v42 = vadd.f32 %v543_v27, %v424_v40 }
 0x2ea   :  { %v545_v29 = vpop.f32.mrf.mxu0 }
 0x2eb   :  { %1040 = vtanh.f32 %v549_v28  ;;  %v667_v48 = vmul.f32 %v666_v43, %v544_v42 }
 0x2ec   :  { %v546_v30 = vpop.f32.mrf.mxu0 }
 0x2f8   :  { %v1041_v31 = vpop.eup %1040 }
 0x2f9   :  { %v551_v32 = vpack.c.bf16 %v1041_v31, %v1041_v31 }
 0x2fb   :  { %926 = vmatmul.mubr.bf16.vlgmr.msra.gmra.mxu1 %v551_v32 }
 0x3bb   :  { %v657_v44 = vpop.f32.mrf.mxu1 }
 0x3bc   :  { %v658_v46 = vadd.f32 %v844_v41, %v657_v44 }
 0x3bd   :  { %v927_v47 = vpop.f32.mrf.mxu1 }
 0x3be   :  { %v664_v49 = vmul.f32 %v663_v45, %v658_v46 }
 0x3bf   :  { %v660_v50 = vpop.f32.mrf.mxu1 }
 0x3c0   :  { %v668_v1 = vadd.f32 %v667_v48, %v664_v49 }
 0x3c1   :  { %v928_v51 = vpop.f32.mrf.mxu1 }
 0x3c2   :  { %v669_v52 = vmul.f32 %v668_v1, %v548_v25 }
 0x3c4   :  { %1042 = vtanh.f32 %v669_v52 }
 0x3d1   :  { %v1043_v33 = vpop.eup %1042 }
 0x3d2   :  { %v671_v53 = vpack.c.bf16 %v1043_v33, %v1043_v33 }
 0x3d4   :  { %946 = vmatmul.mubr.bf16.vlgmr.msra.gmra.mxu0 %v671_v53 }
 0x494   :  { %v777_v55 = vpop.f32.mrf.mxu0 }
 0x495   :  { %v778_v56 = vadd.f32 %v853_v54, %v777_v55 }
 0x496   :  { %v947_v57 = vpop.f32.mrf.mxu0 }
 0x497   :  { %783 = vst [vmem:[#allocation14] sm:$0xff] %v778_v56 }
 0x498   :  { %v780_v58 = vpop.f32.mrf.mxu0 }
 0x499   :  { %1179 = shalt.err (!%p1176_p11)
}
 0x49a   :  { %793 = dma.vmem_to_hbm [thread:$0]  %s791_s0, 128, %s1394_s13, [#allocation7]   ;;  %v948_v59 = vpop.f32.mrf.mxu0 }
 0x49b   :  { %1196 = dma.done.wait [#allocation7], 128  }
 0x49c   :  { %1197 = vsyncadd [#allocation7], 4294967168 }
 0x49d   :  { %797 = vsyncpa [#allocation6], 1 }
 0x49e   :  { %798 = vsyncpa [#allocation9], 1 }
 0x49f   :  { %799 = vsyncpa [#allocation12], 1 }
 0x4a0   :  { %800 = vsyncpa [#allocation7], 1 }

</bundles_post_ra>
